<compile_context>
chip_gen: v5e
topology: v5e:2x2
jax: 0.10.0
libtpu: 0.0.40
codegen_flags: <defaults>
</compile_context>

<pallas_src>
import functools

import numpy as np
import jax
import jax.numpy as jnp
from jax.experimental import pallas as pl
from jax.experimental.pallas import tpu as pltpu


def _round_up(x: int, m: int) -> int:
    return (x + m - 1) // m * m


def _instance_loss_kernel(sel_ref, x_ref, o_ref, *, b_total: int, tile_b: int,
                          n_inner: int):
    """One batch tile of the fused masked-log-softmax loss.

    sel_ref: (8, N) f32; row 0 = selected-column mask, row 1 = one-hot of k.
    x_ref:   (tile_b, N) block of raw scores (input dtype), upcast to f32 here.
    o_ref:   (8, 128) f32 accumulator block, resident across the inner grid axis.
    """
    p = pl.program_id(0)
    i = pl.program_id(1)

    @pl.when(i == 0)
    def _init():
        o_ref[...] = jnp.zeros_like(o_ref)

    x = x_ref[...].astype(jnp.float32)                          # (tile_b, N)
    col_mask = sel_ref[0:1, :] > 0.5                            # (1, N)
    pos_onehot = sel_ref[1:2, :]                                # (1, N)

    # Numerically-stable logsumexp restricted to the selected columns.
    xm = jnp.where(col_mask, x, -jnp.inf)                       # (tile_b, N)
    m = jnp.max(xm, axis=1, keepdims=True)                      # (tile_b, 1)
    s = jnp.sum(jnp.exp(xm - m), axis=1, keepdims=True)         # (tile_b, 1)
    lse = m + jnp.log(s)
    pos = jnp.sum(x * pos_onehot, axis=1, keepdims=True)        # x[:, k]
    per_row = lse - pos                                         # -log_softmax[:, 0]

    # Zero rows past the true batch (sublane pad / partial trailing tile).
    tile_idx = p * n_inner + i
    row_ids = jax.lax.broadcasted_iota(jnp.int32, (tile_b, 1), 0) + tile_idx * tile_b
    per_row = jnp.where(row_ids < b_total, per_row, 0.0)

    # Lane-dense full-block accumulate of this tile's partial sum.
    o_ref[...] += jnp.full((8, 128), jnp.sum(per_row), dtype=jnp.float32)


def instance_loss_pallas(p_score_all: jnp.ndarray, sel: jnp.ndarray) -> jnp.ndarray:
    """p_score_all: (B, N) scores; sel: (8, N) f32 selection mask / one-hot.

    Returns the scalar loss sum_b [ logsumexp_{j in sel}(x[b,j]) - x[b,k] ].
    """
    B, N = p_score_all.shape
    itemsize = jnp.dtype(p_score_all.dtype).itemsize

    # Pad the batch to a sublane multiple only when needed (no-op for typical B).
    b_pad = _round_up(B, 8)
    if b_pad != B:
        p_score_all = jnp.pad(p_score_all, ((0, b_pad - B), (0, 0)))

    # Tile size from the lane-padded footprint:
    #   2 double-buffered input blocks (input dtype) + ~4 full-tile f32 temps.
    n_lanes = _round_up(N, 128)
    per_row_bytes = n_lanes * (2 * itemsize + 4 * 4)
    budget = 24 * 1024 * 1024                       # safe on v7x (64 MiB VMEM)
    tile_b = max(8, min(b_pad, (budget // per_row_bytes) // 8 * 8))
    n_tiles = -(-b_pad // tile_b)

    # Two accumulator partitions (parallel axis) when the tile count allows it,
    # so v7x megacore can shard batch tiles across its two TensorCores.
    n_par = 2 if (n_tiles >= 2 and n_tiles % 2 == 0) else 1
    n_inner = n_tiles // n_par

    ws_bytes = tile_b * per_row_bytes + 2 * 8 * n_lanes * 4 + 2 * 8 * 128 * 4
    vmem_limit = int(min(56 * 1024 * 1024,
                         max(16 * 1024 * 1024, int(ws_bytes * 1.3))))

    kernel = functools.partial(_instance_loss_kernel, b_total=B, tile_b=tile_b,
                               n_inner=n_inner)
    out = pl.pallas_call(
        kernel,
        out_shape=jax.ShapeDtypeStruct((8, 128 * n_par), jnp.float32),
        grid=(n_par, n_inner),
        in_specs=[
            pl.BlockSpec((8, N), lambda p, i: (0, 0)),                 # tiny, stays resident
            pl.BlockSpec((tile_b, N), lambda p, i: (p * n_inner + i, 0)),
        ],
        out_specs=pl.BlockSpec((8, 128), lambda p, i: (0, p)),         # per-partition accumulator
        compiler_params=pltpu.CompilerParams(
            dimension_semantics=("parallel", "arbitrary"),
            vmem_limit_bytes=vmem_limit,
        ),
    )(sel, p_score_all)

    # One scalar per partition (lane 0 of each (8,128) block); <=2 elements.
    partials = out[0, 0::128]
    return jnp.sum(partials)


def instance_loss(p_score_all: jnp.ndarray, k: int, num: int,
                  perm_seed=None) -> jnp.ndarray:
    """Replicates InstanceLoss.forward.

    The random permutation / column selection is host-side glue exactly as in
    the PyTorch module (fresh permutation per call when perm_seed is None).
    NOTE: under jax.jit the selection would be frozen at trace time, exactly
    like any host-side RNG; call un-jitted for fresh permutations.
    """
    N = p_score_all.shape[1]
    rng = np.random if perm_seed is None else np.random.RandomState(perm_seed)
    k_list_0 = rng.permutation(N)
    k_index = int(np.where(k_list_0 == k)[0][0])
    tmp = k_list_0[0]
    k_list_0[0] = k_list_0[k_index]
    k_list_0[k_index] = tmp
    k_list_selected = k_list_0[:num]

    # Selection is encoded as a tiny mask / one-hot array -> no HBM gather.
    sel_np = np.zeros((8, N), dtype=np.float32)
    sel_np[0, k_list_selected] = 1.0    # membership mask of the `num` columns
    sel_np[1, k] = 1.0                  # positive column (slot 0 of the gather)
    return instance_loss_pallas(p_score_all, jnp.asarray(sel_np))


if __name__ == "__main__":
    key = jax.random.PRNGKey(0)
    B, N = 2, 16
    k, num = 3, 8

    p_score_all = jax.random.normal(key, (B, N), dtype=jnp.float32)

    loss = instance_loss(p_score_all, k, num, perm_seed=0)
    loss = jax.block_until_ready(loss)

    # Pure-JAX reference using the same deterministic column selection.
    rng = np.random.RandomState(0)
    k_list_0 = rng.permutation(N)
    k_index = int(np.where(k_list_0 == k)[0][0])
    tmp = k_list_0[0]
    k_list_0[0] = k_list_0[k_index]
    k_list_0[k_index] = tmp
    sel_idx = jnp.asarray(k_list_0[:num])
    ref = jnp.sum(-jax.nn.log_softmax(p_score_all[:, sel_idx], axis=1)[:, 0])

    assert jnp.allclose(loss, ref, atol=1e-5, rtol=1e-5), (loss, ref)
    print("KERNEL_OK")
</pallas_src>

<mosaic_0001>
module attributes {stable_mosaic.version = 11 : i64} {
  func.func @_instance_loss_kernel(%arg0: i32, %arg1: i32, %arg2: memref<8x16xf32, #tpu.memory_space<vmem>>, %arg3: memref<8x16xf32, #tpu.memory_space<vmem>>, %arg4: memref<8x128xf32, #tpu.memory_space<vmem>>) attributes {dimension_semantics = [#tpu.dimension_semantics<parallel>, #tpu.dimension_semantics<arbitrary>], iteration_bounds = array<i64: 1, 1>, scalar_prefetch = 0 : i64, scratch_operands = 0 : i64, tpu.core_type = #tpu.core_type<tc>, window_params = [{pipeline_mode = #tpu.pipeline_mode<synchronous>, transform_indices = @transform_0, window_bounds = array<i64: 8, 16>}, {transform_indices = @transform_1, window_bounds = array<i64: 8, 16>}, {transform_indices = @transform_2, window_bounds = array<i64: 8, 128>}]} {
    %c0_i32 = arith.constant 0 : i32
    %0 = arith.cmpi eq, %arg1, %c0_i32 : i32
    %1 = arith.extui %0 : i1 to i32
    %c0_i32_0 = arith.constant 0 : i32
    %2 = arith.cmpi ne, %1, %c0_i32_0 : i32
    scf.if %2 {
      %cst_15 = arith.constant 0.000000e+00 : f32
      %44 = vector.broadcast %cst_15 : f32 to vector<8x128xf32>
      %c0_16 = arith.constant 0 : index
      %c0_17 = arith.constant 0 : index
      %45 = vector.load %arg4[%c0_16, %c0_17] : memref<8x128xf32, #tpu.memory_space<vmem>>, vector<8x128xf32>
      tpu.vector_store %arg4[%c0_16, %c0_17], %44 {strides = array<i32>} : memref<8x128xf32, #tpu.memory_space<vmem>>, vector<8x128xf32>,
    } else {
    }
    %c0 = arith.constant 0 : index
    %c0_1 = arith.constant 0 : index
    %3 = vector.load %arg3[%c0, %c0_1] : memref<8x16xf32, #tpu.memory_space<vmem>>, vector<8x16xf32>
    %c0_2 = arith.constant 0 : index
    %c0_3 = arith.constant 0 : index
    %4 = vector.load %arg2[%c0_2, %c0_3] : memref<8x16xf32, #tpu.memory_space<vmem>>, vector<1x16xf32>
    %cst = arith.constant 5.000000e-01 : f32
    %5 = vector.broadcast %cst : f32 to vector<1x16xf32>
    %6 = arith.cmpf ogt, %4, %5 : vector<1x16xf32>
    %c1 = arith.constant 1 : index
    %c0_4 = arith.constant 0 : index
    %7 = vector.load %arg2[%c1, %c0_4] : memref<8x16xf32, #tpu.memory_space<vmem>>, vector<1x16xf32>
    %cst_5 = arith.constant 0xFF800000 : f32
    %8 = vector.shape_cast %6 : vector<1x16xi1> to vector<1x16xi1>
    %9 = vector.broadcast %8 : vector<1x16xi1> to vector<8x16xi1>
    %10 = vector.broadcast %cst_5 : f32 to vector<8x16xf32>
    %11 = arith.select %9, %3, %10 : vector<8x16xi1>, vector<8x16xf32>
    %cst_6 = arith.constant dense<0xFF800000> : vector<8xf32>
    %12 = vector.multi_reduction <maximumf>, %11, %cst_6 [1] : vector<8x16xf32> to vector<8xf32>
    %13 = vector.shape_cast %12 : vector<8xf32> to vector<8x1xf32>
    %14 = vector.broadcast %13 : vector<8x1xf32> to vector<8x16xf32>
    %15 = arith.subf %11, %14 : vector<8x16xf32>
    %16 = math.exp %15 : vector<8x16xf32>
    %cst_7 = arith.constant dense<0.000000e+00> : vector<8xf32>
    %17 = vector.multi_reduction <add>, %16, %cst_7 [1] : vector<8x16xf32> to vector<8xf32>
    %18 = vector.shape_cast %17 : vector<8xf32> to vector<8x1xf32>
    %19 = math.log %18 : vector<8x1xf32>
    %20 = arith.addf %13, %19 : vector<8x1xf32>
    %21 = vector.broadcast %7 : vector<1x16xf32> to vector<8x16xf32>
    %22 = arith.mulf %3, %21 : vector<8x16xf32>
    %cst_8 = arith.constant dense<0.000000e+00> : vector<8xf32>
    %23 = vector.multi_reduction <add>, %22, %cst_8 [1] : vector<8x16xf32> to vector<8xf32>
    %24 = vector.shape_cast %23 : vector<8xf32> to vector<8x1xf32>
    %25 = arith.subf %20, %24 : vector<8x1xf32>
    %c1_i32 = arith.constant 1 : i32
    %26 = arith.muli %arg0, %c1_i32 : i32
    %27 = arith.addi %26, %arg1 : i32
    %28 = tpu.iota {dimensions = array<i32: 0>} : vector<8x1xi32>
    %c8_i32 = arith.constant 8 : i32
    %29 = arith.muli %27, %c8_i32 : i32
    %30 = vector.broadcast %29 : i32 to vector<8x1xi32>
    %31 = arith.addi %28, %30 : vector<8x1xi32>
    %c2_i32 = arith.constant 2 : i32
    %32 = vector.broadcast %c2_i32 : i32 to vector<8x1xi32>
    %33 = arith.cmpi slt, %31, %32 : vector<8x1xi32>
    %cst_9 = arith.constant 0.000000e+00 : f32
    %34 = vector.broadcast %cst_9 : f32 to vector<8x1xf32>
    %35 = arith.select %33, %25, %34 : vector<8x1xi1>, vector<8x1xf32>
    %c0_10 = arith.constant 0 : index
    %c0_11 = arith.constant 0 : index
    %36 = vector.load %arg4[%c0_10, %c0_11] : memref<8x128xf32, #tpu.memory_space<vmem>>, vector<8x128xf32>
    %37 = vector.shape_cast %35 : vector<8x1xf32> to vector<1x8x1xf32>
    %cst_12 = arith.constant dense<0.000000e+00> : vector<1xf32>
    %38 = vector.multi_reduction <add>, %37, %cst_12 [1, 2] : vector<1x8x1xf32> to vector<1xf32>
    %39 = vector.shape_cast %38 : vector<1xf32> to vector<1x1x1xf32>
    %40 = vector.extract %39[0, 0, 0] : f32 from vector<1x1x1xf32>
    %41 = vector.broadcast %40 : f32 to vector<8x128xf32>
    %42 = arith.addf %36, %41 : vector<8x128xf32>
    %c0_13 = arith.constant 0 : index
    %c0_14 = arith.constant 0 : index
    %43 = vector.load %arg4[%c0_13, %c0_14] : memref<8x128xf32, #tpu.memory_space<vmem>>, vector<8x128xf32>
    tpu.vector_store %arg4[%c0_13, %c0_14], %42 {strides = array<i32>} : memref<8x128xf32, #tpu.memory_space<vmem>>, vector<8x128xf32>,
    return
  }
  func.func @transform_0(%arg0: i32, %arg1: i32) -> (i32, i32) {
    %c0_i32 = arith.constant 0 : i32
    %c0_i32_0 = arith.constant 0 : i32
    %c0_i32_1 = arith.constant 0 : i32
    return %c0_i32, %c0_i32_0 : i32, i32
  }
  func.func @transform_1(%arg0: i32, %arg1: i32) -> (i32, i32) {
    %c1_i32 = arith.constant 1 : i32
    %0 = arith.muli %arg0, %c1_i32 : i32
    %1 = arith.addi %0, %arg1 : i32
    %c0_i32 = arith.constant 0 : i32
    %c0_i32_0 = arith.constant 0 : i32
    return %1, %c0_i32 : i32, i32
  }
  func.func @transform_2(%arg0: i32, %arg1: i32) -> (i32, i32) {
    %c0_i32 = arith.constant 0 : i32
    %c0_i32_0 = arith.constant 0 : i32
    return %c0_i32, %arg0 : i32, i32
  }
}

</mosaic_0001>

<bundles_post_ra>
// kernel: tpu_custom_call.1
= control target key start
LH: loop header
LB: loop body
LE: loop exit
PB: predicated region body
PF: predicated region fallthrough
CT: control target
= control target key end

     0   :  { %7 = vsyncpa [#allocation3], 0  ;;  %s235_s0 = inlined_call_operand.hbm [shape: f32[8,16], index: 0, kind: input, shape index: {}]   ;;  %s236_s1 = inlined_call_operand.hbm [shape: f32[8,16], index: 1, kind: input, shape index: {}]   ;;  %s237_s2 = inlined_call_operand.hbm [shape: f32[8,128], index: 2, kind: output, shape index: {}]  }
   0x1   :  { %8 = vsyncpa [#allocation6], 0 }
   0x2   :  { %9 = vsyncpa [#allocation4], 0  ;;  %s15_s11 = sshll.u32 %s235_s0, 4  ;;  %s207_s12 = smov [#allocation2]   ;;  %s16_s11 = int_to_ptr.hbm [resolvable:$true] %s15_s11 }
   0x3   :  { %s17_s13 = sshll.u32 %s207_s12, 4  ;;  %s29_s16 = sshll.u32 %s236_s1, 4  ;;  %s18_s13 = int_to_ptr.vmem [resolvable:$true] %s17_s13  ;;  %s30_s16 = int_to_ptr.hbm [resolvable:$true] %s29_s16 }
   0x4   :  { %20 = dma.hbm_to_vmem [thread:$0]  %s16_s11, 128, %s18_s13, [#allocation3]  }
   0x5   :  { %s208_s17 = smov [#allocation5]  }
   0x6   :  { %s31_s18 = sshll.u32 %s208_s17, 4  ;;  %s32_s18 = int_to_ptr.vmem [resolvable:$true] %s31_s18 }
   0x7   :  { %34 = dma.hbm_to_vmem [thread:$0]  %s30_s16, 128, %s32_s18, [#allocation6]  }
   0x8   :  { %201 = dma.done.wait [#allocation3], 128  }
   0x9   :  { %202 = vsyncadd [#allocation3], 4294967168 }
   0xa   :  { %203 = dma.done.wait [#allocation6], 128  }
   0xb   :  { %204 = vsyncadd [#allocation6], 4294967168  ;;  %v50_v0 = vld [vmem:[#allocation2] sm:$0x1]  ;;  %v209_v1 = vmov 0   ;;  %v49_v3 = vld [vmem:[#allocation5] sm:$0xff]  ;;  %v77_v16 = vlaneseq }
   0xc   :  { %vm51_vm0 = vcmp.gt.f32.partialorder %v50_v0, 0.5  ;;  %vm57_vm1 = vcmask 130048   ;;  %v124_v7 = vld [vmem:[#allocation2 + $0x1] ss:$0 sm:$0xff]  ;;  %vm85_vm4 = vcmask 7168   ;;  %s210_s0 = smov [#allocation7]  }
   0xd   :  { %v53_v2 = vsel %vm51_vm0, 1, %v209_v1  ;;  %v71_v8 = vmul.f32 %v124_v7, %v49_v3  ;;  %v78_v18 = vshrl.u32 %v77_v16, 7  ;;  %s104_s1 = sshll.u32 %s210_s0, 4  ;;  %s106_s21 = sshll.u32 %s237_s2, 4  ;;  %s105_s1 = int_to_ptr.vmem [resolvable:$true] %s104_s1  ;;  %s107_s21 = int_to_ptr.hbm [resolvable:$true] %s106_s21 }
   0xe   :  { %v54_v4 = vperm.slane %v53_v2, 0 }
   0xf   :  { %v72_v9 = vsel %vm57_vm1, %v71_v8, 0.0  ;;  %vm82_vm3 = vcmp.lt.s32.totalorder %v78_v18, 2 }
  0x10   :  { %vm55_vm2 = vcmp.eq.s32.totalorder %v54_v4, 1  ;;  %73 = vadd.xlane.f32.xlu1 %v72_v9 }
  0x11   :  { %v56_v5 = vsel %vm55_vm2, %v49_v3, -inf }
  0x12   :  { %v58_v6 = vsel %vm57_vm1, %v56_v5, -inf }
  0x13   :  { %59 = vmax.xlane.f32.xlu0 %v58_v6 }
  0x83   :  { %v74_v20 = vpop.xlane.xlu1 %73 }
  0x86   :  { %v60_v10 = vpop.xlane.xlu0 %59 }
  0x87   :  { %v61_v11 = vsub.f32 %v56_v5, %v60_v10 }
  0x89   :  { %v62_v12 = vmul.f32 1.442695, %v61_v11 }
  0x8b   :  { %125 = vpow2.f32 %v62_v12 }
  0x91   :  { %v126_v13 = vpop.eup %125 }
  0x92   :  { %v64_v14 = vsel %vm57_vm1, %v126_v13, 0.0 }
  0x93   :  { %65 = vadd.xlane.f32.xlu0 %v64_v14 }
 0x106   :  { %v66_v15 = vpop.xlane.xlu0 %65 }
 0x107   :  { %127 = vlog2.f32 %v66_v15 }
 0x10d   :  { %v128_v17 = vpop.eup %127 }
 0x10e   :  { %v68_v19 = vmul.f32 0.6931472, %v128_v17 }
 0x110   :  { %v69_v21 = vadd.f32 %v68_v19, %v60_v10 }
 0x112   :  { %v75_v22 = vsub.f32 %v69_v21, %v74_v20 }
 0x114   :  { %v83_v23 = vsel %vm82_vm3, %v75_v22, 0.0 }
 0x115   :  { %v86_v24 = vsel %vm85_vm4, %v83_v23, 0.0 }
 0x116   :  { %87 = vadd.xlane.f32.xlu1 %v86_v24 }
 0x189   :  { %v88_v25 = vpop.xlane.xlu1 %87 }
 0x18a   :  { %v89_v26 = vrot.slane %v88_v25, 4 }
 0x18c   :  { %v90_v27 = vadd.f32 %v89_v26, %v88_v25 }
 0x18e   :  { %v91_v28 = vrot.slane %v90_v27, 2 }
 0x190   :  { %v92_v29 = vadd.f32 %v91_v28, %v90_v27 }
 0x192   :  { %v93_v30 = vrot.slane %v92_v29, 1 }
 0x194   :  { %v94_v31 = vadd.f32 %v93_v30, %v92_v29 }
 0x196   :  { %117 = vpush %v94_v31 }
 0x1c7   :  { %s118_s22 = spop %117 }
 0x1c8   :  { %v96_v32 = vstv %s118_s22 }
 0x1c9   :  { %98 = vst [vmem:[#allocation7] sm:$0xff] %v96_v32 }
 0x1ca   :  { %109 = dma.vmem_to_hbm [thread:$0]  %s105_s1, 128, %s107_s21, [#allocation4]  }
 0x1cb   :  { %205 = dma.done.wait [#allocation4], 128  }
 0x1cc   :  { %206 = vsyncadd [#allocation4], 4294967168 }
 0x1cd   :  { %114 = vsyncpa [#allocation3], 1 }
 0x1ce   :  { %115 = vsyncpa [#allocation6], 1 }
 0x1cf   :  { %116 = vsyncpa [#allocation4], 1 }

</bundles_post_ra>
